<compile_context>
chip_gen: v7x
topology: tpu7x:2x2x1
jax: 0.10.0
libtpu: 0.0.40
codegen_flags: <defaults>
</compile_context>

<pallas_src>
import jax
import jax.numpy as jnp
from jax.experimental import pallas as pl
from jax.experimental.pallas import tpu as pltpu

_MIB = 1024 * 1024


# ----------------------------------------------------------------------------
# Hardware queries (heuristics only; correctness never depends on them).
# ----------------------------------------------------------------------------
def _vmem_capacity_bytes():
    try:
        info = pltpu.get_tpu_info()
        cap = getattr(info, "vmem_capacity_bytes", None)
        if cap:
            return int(cap)
    except Exception:
        pass
    return 64 * _MIB  # conservative (v7x per-TensorCore)


def _num_tensorcores_per_device():
    try:
        kind = jax.devices()[0].device_kind.lower()
    except Exception:
        return 1
    # Single-TC chips first ("lite" generations).
    if "lite" in kind or "v5e" in kind or "v6e" in kind or "v2" in kind or "v3" in kind:
        return 1
    if "v4" in kind or "v5p" in kind or "v7" in kind:
        return 2
    return 1


# ----------------------------------------------------------------------------
# Tiling policy.
# ----------------------------------------------------------------------------
def _pick_block_batch(B, per_elem_bytes, vmem_budget_bytes, num_cores):
    """Largest divisor of B whose in+out double-buffered tiles fit the budget.

    Single-TC chips: just take the largest fitting divisor (1 grid step is
    fine; splitting only adds ~0.35us/step overhead).
    Dual-TC chips: prefer Bt such that B//Bt is a multiple of num_cores and
    gives each core >= 2 steps (keeps DMA/compute overlap per core).
    """
    max_bt = max(1, vmem_budget_bytes // (4 * per_elem_bytes))
    divisors = [d for d in range(1, B + 1) if B % d == 0]
    fitting = [d for d in divisors if d <= max_bt] or [1]
    if num_cores <= 1:
        return max(fitting)
    pref = [d for d in fitting
            if (B // d) % num_cores == 0 and (B // d) >= 2 * num_cores]
    if pref:
        return max(pref)
    pref = [d for d in fitting if (B // d) % num_cores == 0]
    if pref:
        return max(pref)
    return max(fitting)


def _pick_channel_tile(C, HW, dtype_bytes, vmem_budget_bytes):
    """Channel tile for the two-pass fallback: divisor of C, multiple of 8
    (or C itself), whose in+out double-buffered (Ct, HW) slabs fit."""
    max_ct = max(1, vmem_budget_bytes // (4 * HW * dtype_bytes))
    best = None
    for d in range(1, C + 1):
        if C % d == 0 and d <= max_ct and (d % 8 == 0 or d == C):
            best = d
    if best is None:
        best = 8 if C % 8 == 0 else C
    return best


# ----------------------------------------------------------------------------
# Kernels.
# ----------------------------------------------------------------------------
def _se_fused_kernel(x_ref, w1t_ref, b1_ref, w2t_ref, b2_ref, o_ref):
    # x_ref: (Bt, C, HW) block; lane axis = flattened spatial (dense).
    # Squeeze: mean over the lane axis, accumulated in f32.
    pooled = jnp.mean(x_ref[...], axis=-1, dtype=jnp.float32)            # (Bt, C)

    # Excite: the two 1x1 convs are per-channel FCs -> tiny MXU matmuls,
    # fully hidden under the x DMA.
    h = jnp.dot(pooled, w1t_ref[...],
                preferred_element_type=jnp.float32) + b1_ref[...]        # (Bt, Cr)
    h = jnp.maximum(h, 0.0)
    s = jnp.dot(h, w2t_ref[...],
                preferred_element_type=jnp.float32) + b2_ref[...]        # (Bt, C)
    s = jax.nn.sigmoid(s)

    # Scale: RE-READ x_ref (do not reuse a bound multi-MiB value) so the
    # multiply streams straight from the resident VMEM input buffer.
    o_ref[...] = (x_ref[...] * s.astype(o_ref.dtype)[:, :, None]).astype(o_ref.dtype)


def _se_pool_kernel(x_ref, pooled_ref):
    # x_ref: (1, Ct, HW); pooled_ref: (1, Ct, 1), f32.
    pooled_ref[...] = jnp.mean(x_ref[...], axis=-1, keepdims=True,
                               dtype=jnp.float32)


def _se_scale_kernel(x_ref, s_ref, o_ref):
    # x_ref/o_ref: (1, Ct, HW); s_ref: (1, Ct, 1).
    o_ref[...] = (x_ref[...] * s_ref[...].astype(o_ref.dtype)).astype(o_ref.dtype)


# ----------------------------------------------------------------------------
# Wrapper.
# ----------------------------------------------------------------------------
def se_layer(x, w1, b1, w2, b2, *, vmem_budget_bytes=None):
    """SELayer forward.

    x:  (B, C, H, W)
    w1: (C//r, C)   (Conv2d(C, C//r, 1) weight, squeezed)
    b1: (C//r,)
    w2: (C, C//r)   (Conv2d(C//r, C, 1) weight, squeezed)
    b2: (C,)
    """
    B, C, H, W = x.shape
    Cr = w1.shape[0]
    HW = H * W
    dtype_bytes = jnp.dtype(x.dtype).itemsize

    vmem_cap = _vmem_capacity_bytes()
    num_cores = _num_tensorcores_per_device()
    if vmem_budget_bytes is None:
        # ~half of physical VMEM, capped at 48 MiB: big tiles on v5e/v6e
        # (128 MiB) while staying comfortably inside v7x's 64 MiB.
        vmem_budget_bytes = int(min(48 * _MIB, max(vmem_cap // 2, 16 * _MIB)))
    hard_cap = int(vmem_cap - 8 * _MIB)   # headroom under physical VMEM

    # Lane-dense layout: the flattened spatial axis sits on the 128-lane axis
    # (free reshape of a contiguous NCHW array).
    # TODO(synk): when HW % 128 != 0 but C % 128 == 0, a channels-last
    # (Bt, HW, C) layout avoids masked lane stores; only worth it if the
    # transpose is absorbed upstream, so not done inside this wrapper.
    x3 = x.reshape(B, C, HW)

    # Pre-transpose weights (glue) so the kernel does plain row-major matmuls.
    w1t = jnp.transpose(w1)                 # (C, Cr)
    w2t = jnp.transpose(w2)                 # (Cr, C)
    b1_2d = b1.reshape(1, Cr)
    b2_2d = b2.reshape(1, C)

    wbytes = int((w1t.size + w2t.size + b1_2d.size + b2_2d.size)
                 * jnp.dtype(w1t.dtype).itemsize)
    per_elem_bytes = C * HW * dtype_bytes

    cost = pl.CostEstimate(
        flops=2 * B * C * HW + 2 * 2 * B * C * Cr,    # pool+scale, two FCs
        transcendentals=B * C,                         # sigmoid
        bytes_accessed=2 * B * C * HW * dtype_bytes,   # read x + write out
    )

    if 4 * per_elem_bytes + 2 * wbytes <= vmem_budget_bytes:
        # ---- Single fused pass: read x once, write out once. ----
        Bt = _pick_block_batch(B, per_elem_bytes, vmem_budget_bytes, num_cores)
        grid = (B // Bt,)
        block_bytes = Bt * per_elem_bytes
        vmem_limit = int(min(hard_cap,
                             max(4 * block_bytes + 2 * wbytes + _MIB, 8 * _MIB)))

        out3 = pl.pallas_call(
            _se_fused_kernel,
            out_shape=jax.ShapeDtypeStruct((B, C, HW), x.dtype),
            grid_spec=pltpu.PrefetchScalarGridSpec(
                num_scalar_prefetch=0,
                grid=grid,
                in_specs=[
                    pl.BlockSpec((Bt, C, HW), lambda b: (b, 0, 0)),
                    # Weights/biases: full arrays, constant index maps ->
                    # held resident across the batch grid.
                    pl.BlockSpec((C, Cr), lambda b: (0, 0)),
                    pl.BlockSpec((1, Cr), lambda b: (0, 0)),
                    pl.BlockSpec((Cr, C), lambda b: (0, 0)),
                    pl.BlockSpec((1, C), lambda b: (0, 0)),
                ],
                out_specs=pl.BlockSpec((Bt, C, HW), lambda b: (b, 0, 0)),
            ),
            compiler_params=pltpu.CompilerParams(
                dimension_semantics=("parallel",),
                vmem_limit_bytes=vmem_limit,
            ),
            cost_estimate=cost,
        )(x3, w1t, b1_2d, w2t, b2_2d)
        return out3.reshape(B, C, H, W)

    # ---- Fallback: one batch element's (C, HW) slab doesn't fit the VMEM
    # pipeline budget (e.g. large late-stage CNN shapes on v7x's 64 MiB).
    # Two passes, channel-tiled: Pallas pool -> tiny excite in XLA -> Pallas
    # scale. Costs one extra read of x from HBM but stays within VMEM.
    Ct = _pick_channel_tile(C, HW, dtype_bytes, vmem_budget_bytes)
    grid2 = (B, C // Ct)
    block_bytes = Ct * HW * dtype_bytes
    vmem_limit = int(min(hard_cap, max(4 * block_bytes + _MIB, 8 * _MIB)))

    pooled3 = pl.pallas_call(
        _se_pool_kernel,
        out_shape=jax.ShapeDtypeStruct((B, C, 1), jnp.float32),
        grid_spec=pltpu.PrefetchScalarGridSpec(
            num_scalar_prefetch=0,
            grid=grid2,
            in_specs=[pl.BlockSpec((1, Ct, HW), lambda b, j: (b, j, 0))],
            out_specs=pl.BlockSpec((1, Ct, 1), lambda b, j: (b, j, 0)),
        ),
        compiler_params=pltpu.CompilerParams(
            dimension_semantics=("parallel", "parallel"),
            vmem_limit_bytes=vmem_limit,
        ),
    )(x3)

    # Excite on the tiny (B, C) pooled tensor: plain XLA is fine here.
    pooled = pooled3[..., 0]                                            # (B, C)
    h = jnp.maximum(jnp.dot(pooled, w1t) + b1_2d, 0.0)                  # (B, Cr)
    s = jax.nn.sigmoid(jnp.dot(h, w2t) + b2_2d)                         # (B, C)
    s3 = s[:, :, None]                                                  # (B, C, 1)

    out3 = pl.pallas_call(
        _se_scale_kernel,
        out_shape=jax.ShapeDtypeStruct((B, C, HW), x.dtype),
        grid_spec=pltpu.PrefetchScalarGridSpec(
            num_scalar_prefetch=0,
            grid=grid2,
            in_specs=[
                pl.BlockSpec((1, Ct, HW), lambda b, j: (b, j, 0)),
                pl.BlockSpec((1, Ct, 1), lambda b, j: (b, j, 0)),
            ],
            out_specs=pl.BlockSpec((1, Ct, HW), lambda b, j: (b, j, 0)),
        ),
        compiler_params=pltpu.CompilerParams(
            dimension_semantics=("parallel", "parallel"),
            vmem_limit_bytes=vmem_limit,
        ),
        cost_estimate=cost,
    )(x3, s3)
    return out3.reshape(B, C, H, W)


def se_layer_ref(x, w1, b1, w2, b2):
    """Pure-JAX reference matching the PyTorch module."""
    pooled = jnp.mean(x.astype(jnp.float32), axis=(2, 3))           # (B, C)
    h = jnp.maximum(pooled @ w1.T + b1, 0.0)                        # (B, C//r)
    s = jax.nn.sigmoid(h @ w2.T + b2)                               # (B, C)
    return (x * s[:, :, None, None].astype(x.dtype)).astype(x.dtype)


if __name__ == "__main__":
    # SELayer(channel=32, reduction=16) -> hidden = 2
    B, C, H, W = 2, 32, 16, 16
    reduction = 16
    Cr = C // reduction

    key = jax.random.PRNGKey(0)
    kx, k1, kb1, k2, kb2 = jax.random.split(key, 5)

    x = jax.random.normal(kx, (B, C, H, W), dtype=jnp.float32)
    # Conv2d(C, C//r, 1) weight is (C//r, C, 1, 1) -> squeeze to (C//r, C)
    w1 = jax.random.normal(k1, (Cr, C), dtype=jnp.float32) * 0.1
    b1 = jax.random.normal(kb1, (Cr,), dtype=jnp.float32) * 0.1
    # Conv2d(C//r, C, 1) weight is (C, C//r, 1, 1) -> squeeze to (C, C//r)
    w2 = jax.random.normal(k2, (C, Cr), dtype=jnp.float32) * 0.1
    b2 = jax.random.normal(kb2, (C,), dtype=jnp.float32) * 0.1

    out = se_layer(x, w1, b1, w2, b2)
    out = jax.block_until_ready(out)

    ref = se_layer_ref(x, w1, b1, w2, b2)
    assert out.shape == x.shape and out.dtype == x.dtype
    assert jnp.allclose(out, ref, atol=1e-5, rtol=1e-5), "mismatch vs reference"

    print("KERNEL_OK")
</pallas_src>

<mosaic_0001>
module attributes {stable_mosaic.version = 11 : i64} {
  func.func @_se_fused_kernel(%arg0: i32, %arg1: memref<2x32x256xf32, #tpu.memory_space<vmem>>, %arg2: memref<32x2xf32, #tpu.memory_space<vmem>>, %arg3: memref<1x2xf32, #tpu.memory_space<vmem>>, %arg4: memref<2x32xf32, #tpu.memory_space<vmem>>, %arg5: memref<1x32xf32, #tpu.memory_space<vmem>>, %arg6: memref<2x32x256xf32, #tpu.memory_space<vmem>>) attributes {dimension_semantics = [#tpu.dimension_semantics<parallel>], iteration_bounds = array<i64: 1>, scalar_prefetch = 0 : i64, scratch_operands = 0 : i64, tpu.core_type = #tpu.core_type<tc>, window_params = [{transform_indices = @transform_0, window_bounds = array<i64: 2, 32, 256>}, {pipeline_mode = #tpu.pipeline_mode<synchronous>, transform_indices = @transform_1, window_bounds = array<i64: 32, 2>}, {pipeline_mode = #tpu.pipeline_mode<synchronous>, transform_indices = @transform_2, window_bounds = array<i64: 1, 2>}, {pipeline_mode = #tpu.pipeline_mode<synchronous>, transform_indices = @transform_3, window_bounds = array<i64: 2, 32>}, {pipeline_mode = #tpu.pipeline_mode<synchronous>, transform_indices = @transform_4, window_bounds = array<i64: 1, 32>}, {transform_indices = @transform_5, window_bounds = array<i64: 2, 32, 256>}]} {
    %c0 = arith.constant 0 : index
    %c0_0 = arith.constant 0 : index
    %c0_1 = arith.constant 0 : index
    %0 = vector.load %arg1[%c0, %c0_0, %c0_1] : memref<2x32x256xf32, #tpu.memory_space<vmem>>, vector<2x32x256xf32>
    %cst = arith.constant dense<0.000000e+00> : vector<2x32xf32>
    %1 = vector.multi_reduction <add>, %0, %cst [2] : vector<2x32x256xf32> to vector<2x32xf32>
    %cst_2 = arith.constant 2.560000e+02 : f32
    %2 = vector.broadcast %cst_2 : f32 to vector<2x32xf32>
    %3 = arith.divf %1, %2 : vector<2x32xf32>
    %c0_3 = arith.constant 0 : index
    %c0_4 = arith.constant 0 : index
    %4 = vector.load %arg2[%c0_3, %c0_4] : memref<32x2xf32, #tpu.memory_space<vmem>>, vector<32x2xf32>
    %cst_5 = arith.constant dense<0.000000e+00> : vector<2x2xf32>
    %5 = tpu.matmul %3, %4, %cst_5 {dimension_numbers = #tpu.dot_dimension_numbers<[1], [0], [0], [1], [0, 0, 1, 1], [], []>} : vector<2x32xf32>, vector<32x2xf32>, vector<2x2xf32> -> vector<2x2xf32>
    %c0_6 = arith.constant 0 : index
    %c0_7 = arith.constant 0 : index
    %6 = vector.load %arg3[%c0_6, %c0_7] : memref<1x2xf32, #tpu.memory_space<vmem>>, vector<1x2xf32>
    %7 = vector.broadcast %6 : vector<1x2xf32> to vector<2x2xf32>
    %8 = arith.addf %5, %7 : vector<2x2xf32>
    %cst_8 = arith.constant 0.000000e+00 : f32
    %9 = vector.broadcast %cst_8 : f32 to vector<2x2xf32>
    %10 = arith.maximumf %8, %9 : vector<2x2xf32>
    %c0_9 = arith.constant 0 : index
    %c0_10 = arith.constant 0 : index
    %11 = vector.load %arg4[%c0_9, %c0_10] : memref<2x32xf32, #tpu.memory_space<vmem>>, vector<2x32xf32>
    %cst_11 = arith.constant dense<0.000000e+00> : vector<2x32xf32>
    %12 = tpu.matmul %10, %11, %cst_11 {dimension_numbers = #tpu.dot_dimension_numbers<[1], [0], [0], [1], [0, 0, 1, 1], [], []>} : vector<2x2xf32>, vector<2x32xf32>, vector<2x32xf32> -> vector<2x32xf32>
    %c0_12 = arith.constant 0 : index
    %c0_13 = arith.constant 0 : index
    %13 = vector.load %arg5[%c0_12, %c0_13] : memref<1x32xf32, #tpu.memory_space<vmem>>, vector<1x32xf32>
    %14 = vector.broadcast %13 : vector<1x32xf32> to vector<2x32xf32>
    %15 = arith.addf %12, %14 : vector<2x32xf32>
    %16 = arith.negf %15 : vector<2x32xf32>
    %17 = math.exp %16 : vector<2x32xf32>
    %cst_14 = arith.constant 1.000000e+00 : f32
    %18 = vector.broadcast %cst_14 : f32 to vector<2x32xf32>
    %19 = arith.addf %18, %17 : vector<2x32xf32>
    %20 = arith.divf %18, %19 : vector<2x32xf32>
    %c0_15 = arith.constant 0 : index
    %c0_16 = arith.constant 0 : index
    %c0_17 = arith.constant 0 : index
    %21 = vector.load %arg1[%c0_15, %c0_16, %c0_17] : memref<2x32x256xf32, #tpu.memory_space<vmem>>, vector<2x32x256xf32>
    %22 = vector.shape_cast %20 : vector<2x32xf32> to vector<2x32x1xf32>
    %23 = vector.broadcast %22 : vector<2x32x1xf32> to vector<2x32x256xf32>
    %24 = arith.mulf %21, %23 : vector<2x32x256xf32>
    %c0_18 = arith.constant 0 : index
    %c0_19 = arith.constant 0 : index
    %c0_20 = arith.constant 0 : index
    %25 = vector.load %arg6[%c0_18, %c0_19, %c0_20] : memref<2x32x256xf32, #tpu.memory_space<vmem>>, vector<2x32x256xf32>
    tpu.vector_store %arg6[%c0_18, %c0_19, %c0_20], %24 {strides = array<i32>} : memref<2x32x256xf32, #tpu.memory_space<vmem>>, vector<2x32x256xf32>,
    return
  }
  func.func @transform_0(%arg0: i32) -> (i32, i32, i32) {
    %c0_i32 = arith.constant 0 : i32
    %c0_i32_0 = arith.constant 0 : i32
    %c0_i32_1 = arith.constant 0 : i32
    return %arg0, %c0_i32, %c0_i32_0 : i32, i32, i32
  }
  func.func @transform_1(%arg0: i32) -> (i32, i32) {
    %c0_i32 = arith.constant 0 : i32
    %c0_i32_0 = arith.constant 0 : i32
    %c0_i32_1 = arith.constant 0 : i32
    return %c0_i32, %c0_i32_0 : i32, i32
  }
  func.func @transform_2(%arg0: i32) -> (i32, i32) {
    %c0_i32 = arith.constant 0 : i32
    %c0_i32_0 = arith.constant 0 : i32
    %c0_i32_1 = arith.constant 0 : i32
    return %c0_i32, %c0_i32_0 : i32, i32
  }
  func.func @transform_3(%arg0: i32) -> (i32, i32) {
    %c0_i32 = arith.constant 0 : i32
    %c0_i32_0 = arith.constant 0 : i32
    %c0_i32_1 = arith.constant 0 : i32
    return %c0_i32, %c0_i32_0 : i32, i32
  }
  func.func @transform_4(%arg0: i32) -> (i32, i32) {
    %c0_i32 = arith.constant 0 : i32
    %c0_i32_0 = arith.constant 0 : i32
    %c0_i32_1 = arith.constant 0 : i32
    return %c0_i32, %c0_i32_0 : i32, i32
  }
  func.func @transform_5(%arg0: i32) -> (i32, i32, i32) {
    %c0_i32 = arith.constant 0 : i32
    %c0_i32_0 = arith.constant 0 : i32
    %c0_i32_1 = arith.constant 0 : i32
    return %arg0, %c0_i32, %c0_i32_0 : i32, i32, i32
  }
}

</mosaic_0001>

<bundles_post_ra>
// kernel: tpu_custom_call.1
= control target key start
LH: loop header
LB: loop body
LE: loop exit
PB: predicated region body
PF: predicated region fallthrough
CT: control target
= control target key end

     0   :  { %10 = vsyncpa [#allocation3], 0  ;;  %s658_s0 = inlined_call_operand.hbm [shape: f32[2,32,256], index: 0, kind: input, shape index: {}]   ;;  %s659_s1 = inlined_call_operand.vmem [shape: f32[32,2], index: 1, kind: input, shape index: {}]   ;;  %s660_s2 = inlined_call_operand.vmem [shape: f32[1,2], index: 2, kind: input, shape index: {}]   ;;  %s661_s3 = inlined_call_operand.vmem [shape: f32[2,32], index: 3, kind: input, shape index: {}]   ;;  %s662_s4 = inlined_call_operand.vmem [shape: f32[1,32], index: 4, kind: input, shape index: {}]   ;;  %s663_s5 = inlined_call_operand.hbm [shape: f32[2,32,256], index: 5, kind: output, shape index: {}]  }
   0x1   :  { %11 = vsyncpa [#allocation4], 0  ;;  %s498_s18 = smov [#allocation2]   ;;  %s450_s22 = scalar_lea.hbm %s658_s0, 2048 }
   0x2   :  { %s17_s19 = sshll.u32 %s498_s18, 4  ;;  %p451_p0 = scmp.ne.s32.totalorder %s658_s0, %s450_s22  ;;  %s18_s19 = int_to_ptr.vmem [resolvable:$true] %s17_s19 }
   0x3   :  { %p454_p1 = scmp.lt.u32.totalorder %s450_s22, %s658_s0 }
   0x5   :  { %p456_p2 = pnand %p454_p1, %p451_p0 }
   0x7   :  { %459 = shalt.err (!%p456_p2)
}
   0x8   :  { %s460_s27 = scalar_lea.vmem %s18_s19, 2048  ;;  %p465_p4 = scmp.lt.s32.totalorder %s18_s19, %s18_s19 }
   0x9   :  { %p461_p3 = scmp.ne.s32.totalorder %s18_s19, %s460_s27  ;;  %p466_p5 = scmp.lt.s32.totalorder %s460_s27, %s460_s27 }
   0xb   :  { %p467_p6 = por %p466_p5, %p465_p4 }
   0xd   :  { %p468_p7 = pnand %p467_p6, %p461_p3 }
   0xf   :  { %471 = shalt.err (!%p468_p7)
}
  0x10   :  { %s499_s28 = smov 256   ;;  %s500_s29 = smov 16  }
  0x11   :  { %23 = dma.hbm_to_vmem [thread:$0]  %s658_s0, 2048, %s18_s19, [#allocation3], %s499_s28, %s499_s28, %s500_s29  }
  0x12   :  { %494 = dma.done.wait [#allocation3], 2048  }
  0x13   :  { %495 = vsyncadd [#allocation3], 4294965248  ;;  %v550_v0 = vld [vmem:[#allocation2 + $0x40] sm:$0xff]  ;;  %v552_v1 = vld [vmem:[#allocation2 + $0x48] sm:$0xff]  ;;  %v501_v27 = vmov 0.0|0.0   ;;  %vm502_vm0 = vmmov 0   ;;  %v103_v32 = vlaneseq }
  0x14   :  { %v554_v2 = vld [vmem:[#allocation2] sm:$0xff]  ;;  %v63_v3 = vadd.f32 %v552_v1, %v550_v0  ;;  %v558_v4 = vld [vmem:[#allocation2 + $0x8] sm:$0xff]  ;;  %v560_v5 = vld [vmem:[#allocation2 + $0x50] sm:$0xff]  ;;  %433 = vmatprep.subr.bf16.mxu0 %v501_v27  ;;  %v503_v31 = vmov 0.0   ;;  %vm114_vm1 = vcmask 130112   ;;  %vm121_vm2 = vcmask 195712  }
  0x15   :  { %v562_v6 = vld [vmem:[#allocation2 + $0x58] sm:$0xff]  ;;  %v51_v7 = vadd.f32 %v558_v4, %v554_v2  ;;  %v566_v8 = vld [vmem:[#allocation2 + $0x10] sm:$0xff]  ;;  %v574_v12 = vld [vmem:[#allocation2 + $0x60] sm:$0xff]  ;;  %425 = vmatprep.mubr.msk.f32.mxu0 %vm502_vm0, %v503_v31  ;;  %428 = vmatprep.subr.mxu1 %v503_v31  ;;  %v104_v34 = vand.u32 127, %v103_v32  ;;  %v610_v39 = vshrl.u32 %v103_v32, 7  ;;  %vm128_vm3 = vcmask 261312  }
  0x16   :  { %v568_v9 = vld [vmem:[#allocation2 + $0x18] sm:$0xff]  ;;  %64 = vadd.xlane.f32.xlu1 %v63_v3  ;;  %v66_v10 = vadd.f32 %v562_v6, %v560_v5  ;;  %v576_v13 = vld [vmem:[#allocation2 + $0x68] sm:$0xff]  ;;  %v578_v14 = vld [vmem:[#allocation2 + $0x20] sm:$0xff]  ;;  %430 = vmatprep.mubr.msk.f32.mxu1 %vm502_vm0, %v503_v31  ;;  %vm149_vm4 = vcmask 1041409   ;;  %vm151_vm5 = vcmask 261120   ;;  %vm237_vm6 = vcmask 1041408  }
  0x17   :  { %52 = vadd.xlane.f32.xlu0 %v51_v7  ;;  %v54_v11 = vadd.f32 %v568_v9, %v566_v8  ;;  %v580_v15 = vld [vmem:[#allocation2 + $0x28] sm:$0xff]  ;;  %v69_v16 = vadd.f32 %v576_v13, %v574_v12  ;;  %v586_v18 = vld [vmem:[#allocation2 + $0x70] sm:$0xff]  ;;  %v588_v19 = vld [vmem:[#allocation2 + $0x78] sm:$0xff]  ;;  %v109_v36 = vadd.s32 4294967288, %v104_v34  ;;  %v116_v38 = vadd.s32 4294967280, %v104_v34 }
  0x18   :  { %v57_v17 = vadd.f32 %v580_v15, %v578_v14  ;;  %v590_v20 = vld [vmem:[#allocation2 + $0x30] sm:$0xff]  ;;  %v592_v21 = vld [vmem:[#allocation2 + $0x38] sm:$0xff]  ;;  %v72_v22 = vadd.f32 %v588_v19, %v586_v18  ;;  %v84_v24 = vld [vmem:[%s659_s1] sm:$0xff]  ;;  %v123_v43 = vadd.s32 4294967272, %v104_v34  ;;  %v107_v47 = vsub.s32 %v104_v34, %v610_v39 }
  0x19   :  { %v60_v23 = vadd.f32 %v592_v21, %v590_v20  ;;  %v85_v25 = vld [vmem:[%s659_s1 + $0x8] sm:$0xff]  ;;  %v86_v28 = vld [vmem:[%s659_s1 + $0x10] sm:$0xff]  ;;  %v87_v29 = vld [vmem:[%s659_s1 + $0x18] sm:$0xff]  ;;  %v112_v41 = vsub.s32 %v109_v36, %v610_v39  ;;  %v119_v45 = vsub.s32 %v116_v38, %v610_v39  ;;  %vm233_vm7 = vcmask 15360  }
  0x1a   :  { %67 = vadd.xlane.f32.xlu1 %v66_v10  ;;  %v434_v26 = vpack.c.bf16 %v85_v25, %v84_v24  ;;  %v437_v30 = vpack.c.bf16 %v87_v29, %v86_v28  ;;  %v126_v54 = vsub.s32 %v123_v43, %v610_v39  ;;  %v225_v25 = vld [vmem:[%s661_s3] sm:$0x3]  ;;  %v319_v38 = vsub.s32 0, %v610_v39 }
  0x1b   :  { %55 = vadd.xlane.f32.xlu0 %v54_v11  ;;  %429 = vmatpush3.msk.msra.mxu1 %vm237_vm6, %v225_v25  ;;  %v406_v31 = vld [vmem:[%s662_s4] ss:$0 sm:$0xff] }
  0x1c   :  { %435 = vmatpush3.bf16.msra.mxu0 %v434_v26  ;;  %v404_v26 = vld [vmem:[%s660_s2] ss:$0 sm:$0xff]  ;;  %s504_s2 = smov [#allocation5]  }
  0x1d   :  { %436 = vmatprep.subr.bf16.mxu0 %v501_v27  ;;  %s392_s3 = sshll.u32 %s504_s2, 4  ;;  %s393_s3 = int_to_ptr.vmem [resolvable:$true] %s392_s3 }
  0x1e   :  { %70 = vadd.xlane.f32.xlu1 %v69_v16  ;;  %s472_s4 = scalar_lea.vmem %s393_s3, 2048  ;;  %p477_p9 = scmp.lt.s32.totalorder %s393_s3, %s393_s3 }
  0x1f   :  { %58 = vadd.xlane.f32.xlu0 %v57_v17  ;;  %p473_p8 = scmp.ne.s32.totalorder %s393_s3, %s472_s4  ;;  %p478_p10 = scmp.lt.s32.totalorder %s472_s4, %s472_s4 }
  0x20   :  { %438 = vmatpush3.bf16.msra.mxu0 %v437_v30 }
  0x21   :  { %p479_p11 = por %p478_p10, %p477_p9 }
  0x22   :  { %73 = vadd.xlane.f32.xlu1 %v72_v22 }
  0x23   :  { %61 = vadd.xlane.f32.xlu0 %v60_v23  ;;  %p480_p12 = pnand %p479_p11, %p473_p8 }
  0xa3   :  { %v65_v33 = vpop.xlane.xlu1 %64 }
  0xa4   :  { %v53_v35 = vpop.xlane.xlu0 %52  ;;  %v80_v48 = vmul.f32 0.00390625, %v65_v33 }
  0xa5   :  { %v76_v51 = vmul.f32 0.00390625, %v53_v35 }
  0xa6   :  { %v133_v58 = vrot.slane %v80_v48, %v107_v47 }
  0xa7   :  { %v68_v37 = vpop.xlane.xlu1 %67  ;;  %v108_v62 = vrot.slane %v76_v51, %v107_v47 }
  0xa8   :  { %v56_v40 = vpop.xlane.xlu0 %55  ;;  %v81_v42 = vmul.f32 0.00390625, %v68_v37 }
  0xa9   :  { %v77_v44 = vmul.f32 0.00390625, %v56_v40 }
  0xaa   :  { %v137_v53 = vrot.slane %v81_v42, %v112_v41  ;;  %v338_v42 = vsub.s32 1, %v610_v39 }
  0xab   :  { %v71_v46 = vpop.xlane.xlu1 %70  ;;  %v113_v55 = vrot.slane %v77_v44, %v112_v41 }
  0xac   :  { %v82_v49 = vmul.f32 0.00390625, %v71_v46  ;;  %v59_v50 = vpop.xlane.xlu0 %58  ;;  %v138_v3 = vsel %vm114_vm1, %v137_v53, %v133_v58 }
  0xad   :  { %v78_v52 = vmul.f32 0.00390625, %v59_v50  ;;  %v115_v10 = vsel %vm114_vm1, %v113_v55, %v108_v62 }
  0xae   :  { %v142_v56 = vrot.slane %v82_v49, %v119_v45 }
  0xaf   :  { %v74_v57 = vpop.xlane.xlu1 %73  ;;  %v120_v59 = vrot.slane %v78_v52, %v119_v45 }
  0xb0   :  { %v83_v60 = vmul.f32 0.00390625, %v74_v57  ;;  %v62_v61 = vpop.xlane.xlu0 %61  ;;  %v143_v11 = vsel %vm121_vm2, %v142_v56, %v138_v3 }
  0xb1   :  { %v79_v63 = vmul.f32 0.00390625, %v62_v61  ;;  %v122_v17 = vsel %vm121_vm2, %v120_v59, %v115_v10 }
  0xb2   :  { %v147_v7 = vrot.slane %v83_v60, %v126_v54 }
  0xb3   :  { %v127_v16 = vrot.slane %v79_v63, %v126_v54 }
  0xb4   :  { %v148_v22 = vsel %vm128_vm3, %v147_v7, %v143_v11 }
  0xb5   :  { %v129_v23 = vsel %vm128_vm3, %v127_v16, %v122_v17 }
  0xb6   :  { %v150_v24 = vsel %vm149_vm4, %v148_v22, %v129_v23 }
  0xb7   :  { %426 = vmatmul.mubr.msk.f32.vlgmr.msra.gmra.mrb[0].mxu0 %vm151_vm5, %v150_v24 }
 0x18a   :  { %v220_v27 = vpop.f32.mrb[0].mxu0 }
 0x18b   :  { %v221_v28 = vadd.f32 %v404_v26, %v220_v27  ;;  %v427_v29 = vpop.f32.mrb[1].mxu0 }
 0x18d   :  { %v224_v30 = vmax.f32 %v221_v28, 0.0 }
 0x18f   :  { %431 = vmatmul.mubr.msk.f32.vlgmr.msra.gmra.mrb[0].mxu1 %vm233_vm7, %v224_v30 }
 0x262   :  { %v307_v32 = vpop.f32.mrb[0].mxu1 }
 0x263   :  { %v308_v33 = vadd.f32 %v406_v31, %v307_v32  ;;  %v432_v34 = vpop.f32.mrb[1].mxu1 }
 0x265   :  { %v409_v35 = vmul.f32 -1.442695, %v308_v33 }
 0x267   :  { %446 = vpow2.f32 %v409_v35 }
 0x271   :  { %v447_v36 = vpop.eup %446 }
 0x272   :  { %v314_v37 = vadd.f32 1.0, %v447_v36 }
 0x274   :  { %448 = vrcp.f32 %v314_v37 }
 0x27e   :  { %v449_v40 = vpop.eup %448 }
 0x27f   :  { %v320_v41 = vrot.slane %v449_v40, %v319_v38  ;;  %v339_v43 = vrot.slane %v449_v40, %v338_v42 }
 0x281   :  { %326 = vbcast.lane.b32.xlu1 %v320_v41, 264  ;;  %322 = vbcast.lane.b32.xlu0 %v320_v41, 256 }
 0x285   :  { %330 = vbcast.lane.b32.xlu1 %v320_v41, 272  ;;  %341 = vbcast.lane.b32.xlu0 %v339_v43, 256 }
 0x289   :  { %334 = vbcast.lane.b32.xlu1 %v320_v41, 280  ;;  %349 = vbcast.lane.b32.xlu0 %v339_v43, 272 }
 0x28d   :  { %345 = vbcast.lane.b32.xlu1 %v339_v43, 264 }
 0x291   :  { %353 = vbcast.lane.b32.xlu1 %v339_v43, 280 }
 0x2f3   :  { %v327_v44 = vpop.permute.xlu1 %326  ;;  %v323_v45 = vpop.permute.xlu0 %322 }
 0x2f4   :  { %v357_v46 = vmul.f32 %v327_v44, %v566_v8  ;;  %v358_v47 = vmul.f32 %v327_v44, %v568_v9  ;;  %v355_v48 = vmul.f32 %v323_v45, %v554_v2  ;;  %v356_v49 = vmul.f32 %v323_v45, %v558_v4 }
 0x2f6   :  { %373 = vst [vmem:[#allocation5 + $0x10] sm:$0xff] %v357_v46  ;;  %374 = vst [vmem:[#allocation5 + $0x18] sm:$0xff] %v358_v47 }
 0x2f7   :  { %371 = vst [vmem:[#allocation5] sm:$0xff] %v355_v48  ;;  %372 = vst [vmem:[#allocation5 + $0x8] sm:$0xff] %v356_v49  ;;  %v331_v39 = vpop.permute.xlu1 %330  ;;  %v342_v50 = vpop.permute.xlu0 %341 }
 0x2f8   :  { %v359_v51 = vmul.f32 %v331_v39, %v578_v14  ;;  %v360_v52 = vmul.f32 %v331_v39, %v580_v15  ;;  %v363_v53 = vmul.f32 %v342_v50, %v550_v0  ;;  %v364_v8 = vmul.f32 %v342_v50, %v552_v1 }
 0x2fa   :  { %375 = vst [vmem:[#allocation5 + $0x20] sm:$0xff] %v359_v51  ;;  %376 = vst [vmem:[#allocation5 + $0x28] sm:$0xff] %v360_v52 }
 0x2fb   :  { %379 = vst [vmem:[#allocation5 + $0x40] sm:$0xff] %v363_v53  ;;  %380 = vst [vmem:[#allocation5 + $0x48] sm:$0xff] %v364_v8  ;;  %v335_v2 = vpop.permute.xlu1 %334  ;;  %v350_v4 = vpop.permute.xlu0 %349 }
 0x2fc   :  { %v361_v9 = vmul.f32 %v335_v2, %v590_v20  ;;  %v362_v54 = vmul.f32 %v335_v2, %v592_v21  ;;  %v367_v55 = vmul.f32 %v350_v4, %v574_v12  ;;  %v368_v14 = vmul.f32 %v350_v4, %v576_v13 }
 0x2fe   :  { %377 = vst [vmem:[#allocation5 + $0x30] sm:$0xff] %v361_v9  ;;  %378 = vst [vmem:[#allocation5 + $0x38] sm:$0xff] %v362_v54 }
 0x2ff   :  { %383 = vst [vmem:[#allocation5 + $0x60] sm:$0xff] %v367_v55  ;;  %384 = vst [vmem:[#allocation5 + $0x68] sm:$0xff] %v368_v14  ;;  %v346_v0 = vpop.permute.xlu1 %345 }
 0x300   :  { %v365_v1 = vmul.f32 %v346_v0, %v560_v5  ;;  %v366_v15 = vmul.f32 %v346_v0, %v562_v6 }
 0x302   :  { %381 = vst [vmem:[#allocation5 + $0x50] sm:$0xff] %v365_v1  ;;  %382 = vst [vmem:[#allocation5 + $0x58] sm:$0xff] %v366_v15 }
 0x303   :  { %v354_v20 = vpop.permute.xlu1 %353 }
 0x304   :  { %v369_v21 = vmul.f32 %v354_v20, %v586_v18  ;;  %v370_v12 = vmul.f32 %v354_v20, %v588_v19 }
 0x306   :  { %385 = vst [vmem:[#allocation5 + $0x70] sm:$0xff] %v369_v21  ;;  %386 = vst [vmem:[#allocation5 + $0x78] sm:$0xff] %v370_v12 }
 0x307   :  { %483 = shalt.err (!%p480_p12)
}
 0x308   :  { %s484_s21 = scalar_lea.hbm %s663_s5, 2048 }
 0x309   :  { %p485_p13 = scmp.ne.s32.totalorder %s663_s5, %s484_s21  ;;  %p488_p0 = scmp.lt.u32.totalorder %s484_s21, %s663_s5 }
 0x30b   :  { %p490_p1 = pnand %p488_p0, %p485_p13 }
 0x30d   :  { %493 = shalt.err (!%p490_p1)
}
 0x30e   :  { %398 = dma.vmem_to_hbm [thread:$0]  %s393_s3, 2048, %s663_s5, [#allocation4], %s499_s28, %s499_s28, %s500_s29  }
 0x30f   :  { %496 = dma.done.wait [#allocation4], 2048  }
 0x310   :  { %497 = vsyncadd [#allocation4], 4294965248 }
 0x311   :  { %402 = vsyncpa [#allocation3], 1 }
 0x312   :  { %403 = vsyncpa [#allocation4], 1 }

</bundles_post_ra>
